<compile_context>
chip_gen: v7x
topology: tpu7x:2x2x1
jax: 0.10.0
libtpu: 0.0.40
codegen_flags: <defaults>
</compile_context>

<pallas_src>
import functools

import jax
import jax.numpy as jnp
from jax.experimental import pallas as pl
from jax.experimental.pallas import tpu as pltpu

_EPS = 1e-12          # F.normalize default eps
_NEG_FILL = -1.0e30   # fill for padded class lanes: exp() underflows to exactly 0


# ------------------------------ sizing helpers -------------------------------
def _round_up(x, m):
    return ((x + m - 1) // m) * m


def _vmem_capacity_bytes():
    """Physical VMEM per TensorCore (v5e/v6e: 128 MiB, v7x: 64 MiB)."""
    try:
        cap = getattr(pltpu.get_tpu_info(), "vmem_capacity_bytes", None)
        if cap:
            return int(cap)
    except Exception:
        pass
    return 64 << 20   # conservative default (v7x-sized)


def _input_budget_bytes():
    """Bytes allowed for (double-buffered inputs + accumulators) per call."""
    cap = _vmem_capacity_bytes()
    # ~1/8 of physical VMEM, capped: 16 MiB on v5e/v6e, 8 MiB on v7x.
    return min(16 << 20, max(4 << 20, cap // 8))


def _vmem_limit_bytes(needed):
    cap = _vmem_capacity_bytes()
    return int(min(max(cap - (2 << 20), 8 << 20), max(needed + (4 << 20), 32 << 20)))


def _pick_divisor_tile(full, unit, cap):
    """Largest multiple of `unit` dividing `full`, capped at `cap`.
    `full` must already be a multiple of `unit` (callers pad first)."""
    assert full % unit == 0
    t = max(unit, (min(cap, full) // unit) * unit)
    while full % t != 0:
        t -= unit
    return t


def _pick_kd_batch_tile(batch, row_bytes, budget):
    """Rows per KD block: the full batch, or a divisor of B that is a multiple
    of 8 (sublane rule), whichever is the largest that fits the budget."""
    cap = max(1, budget // max(row_bytes, 1))
    if batch <= cap:
        return batch
    d = (min(cap, batch) // 8) * 8
    while d >= 8:
        if batch % d == 0:
            return d
        d -= 8
    return batch   # no aligned divisor fits; vmem_limit is raised to match


def _pick_at_batch_tile(batch, per_row_lane_bytes, min_lanes, budget):
    """Largest divisor of B whose minimal (min_lanes-wide) chunk fits the budget."""
    cap = max(1, budget // max(per_row_lane_bytes * min_lanes, 1))
    return max(d for d in range(1, batch + 1) if batch % d == 0 and d <= cap)


# ------------------------- KD (KL-divergence) kernel -------------------------
def _kd_kernel(ys_ref, yt_ref, o_ref, ms_ref, ds_ref, mt_ref, dt_ref, dd_ref,
               *, inv_t):
    """Streaming KL(p_t || p_s) over class chunks.

    Grid (batch_block, class_chunk).  Per-row online accumulators in VMEM:
      ms/ds : running max / rescaled sum(exp) of the student logits
      mt/dt : running max / rescaled sum(exp) of the teacher logits
      dd    : running sum of exp(t - mt) * (t - s)
    Finalize: KL_row = dd/dt + (ms - mt) + (log ds - log dt).
    """
    k = pl.program_id(1)

    @pl.when(k == 0)
    def _():
        ms_ref[...] = jnp.full(ms_ref.shape, _NEG_FILL, dtype=ms_ref.dtype)
        mt_ref[...] = jnp.full(mt_ref.shape, _NEG_FILL, dtype=mt_ref.dtype)
        ds_ref[...] = jnp.zeros(ds_ref.shape, ds_ref.dtype)
        dt_ref[...] = jnp.zeros(dt_ref.shape, dt_ref.dtype)
        dd_ref[...] = jnp.zeros(dd_ref.shape, dd_ref.dtype)

    ys = ys_ref[...].astype(jnp.float32) * inv_t       # (TB, TK)
    yt = yt_ref[...].astype(jnp.float32) * inv_t

    # Student: online logsumexp.
    ms_new = jnp.maximum(ms_ref[...], jnp.max(ys, axis=1, keepdims=True))
    ds_ref[...] = (ds_ref[...] * jnp.exp(ms_ref[...] - ms_new)
                   + jnp.sum(jnp.exp(ys - ms_new), axis=1, keepdims=True))
    ms_ref[...] = ms_new

    # Teacher: online softmax statistics + exp-weighted logit difference.
    mt_new = jnp.maximum(mt_ref[...], jnp.max(yt, axis=1, keepdims=True))
    r = jnp.exp(mt_ref[...] - mt_new)
    et = jnp.exp(yt - mt_new)
    dt_ref[...] = dt_ref[...] * r + jnp.sum(et, axis=1, keepdims=True)
    dd_ref[...] = dd_ref[...] * r + jnp.sum(et * (yt - ys), axis=1, keepdims=True)
    mt_ref[...] = mt_new

    @pl.when(k == pl.num_programs(1) - 1)
    def _():
        # sum_k p_k*(log p_k - log_softmax(s)_k), per row, then summed over rows.
        kl_rows = (dd_ref[...] / dt_ref[...]
                   + ms_ref[...] - mt_ref[...]
                   + jnp.log(ds_ref[...]) - jnp.log(dt_ref[...]))
        o_ref[...] = jnp.broadcast_to(jnp.sum(kl_rows), o_ref.shape)


def kd_loss(y_s, y_t, temperature):
    B, K = y_s.shape
    itemsize = max(y_s.dtype.itemsize, y_t.dtype.itemsize)
    budget = _input_budget_bytes()
    scratch_row = 5 * 128 * 4                      # five lane-padded f32 accumulators

    row_bytes_full = 4 * K * itemsize + scratch_row   # 2 inputs x 2 pipeline buffers
    if min(B, 8) * row_bytes_full <= budget:
        # Whole class dim fits per block: single class chunk, no padding needed.
        K_pad, TK = K, K
        ys2, yt2 = y_s, y_t
        TB = _pick_kd_batch_tile(B, row_bytes_full, budget)
    else:
        # Vocab-scale classes: stream 128-aligned class chunks (online softmax).
        K_pad = _round_up(K, 128)
        cap_k = max(128,
                    (((budget // min(B, 8)) - scratch_row) // (4 * itemsize))
                    // 128 * 128)
        TK = _pick_divisor_tile(K_pad, 128, cap_k)
        TB = _pick_kd_batch_tile(B, 4 * TK * itemsize + scratch_row, budget)
        if K_pad != K:
            pad = ((0, 0), (0, K_pad - K))
            ys2 = jnp.pad(y_s, pad, constant_values=_NEG_FILL)
            yt2 = jnp.pad(y_t, pad, constant_values=_NEG_FILL)
        else:
            ys2, yt2 = y_s, y_t
    n_b, n_k = B // TB, K_pad // TK

    kern = functools.partial(_kd_kernel, inv_t=1.0 / float(temperature))
    cost = pl.CostEstimate(
        flops=int(12 * B * K_pad),
        transcendentals=int(2 * B * K_pad + 6 * B),
        bytes_accessed=int(ys2.size * ys2.dtype.itemsize
                           + yt2.size * yt2.dtype.itemsize + n_b * 128 * 4),
    )
    needed = (4 * TB * TK * itemsize               # 2 inputs x 2 pipeline buffers
              + 5 * max(TB, 8) * 128 * 4           # accumulators (padded layout)
              + 2 * 128 * 4)                       # output block double buffer
    partials = pl.pallas_call(
        kern,
        out_shape=jax.ShapeDtypeStruct((n_b, 1, 128), jnp.float32),
        grid=(n_b, n_k),
        in_specs=[
            pl.BlockSpec((TB, TK), lambda b, k: (b, k)),
            pl.BlockSpec((TB, TK), lambda b, k: (b, k)),
        ],
        out_specs=pl.BlockSpec((1, 1, 128), lambda b, k: (b, 0, 0)),
        scratch_shapes=[pltpu.VMEM((TB, 1), jnp.float32)] * 5,
        compiler_params=pltpu.CompilerParams(
            dimension_semantics=("parallel", "arbitrary"),
            vmem_limit_bytes=_vmem_limit_bytes(needed)),
        cost_estimate=cost,
    )(ys2, yt2)

    t = float(temperature)
    return jnp.sum(partials[:, 0, 0]) * (t * t) / float(B)


# --------------------- Attention-transfer (at_loss) kernel -------------------
def _at_kernel(fs_ref, ft_ref, o_ref, ss_ref, tt_ref, st_ref, *, inv_c):
    """Grid (batch_block, hw_chunk); blocks (TBb, C, THW): C sublanes, HW lanes.
    Accumulate lane-wise partial sums of a_s^2 / a_t^2 / a_s*a_t (a = mean_C f^2);
    the L2-normalized squared difference is recovered per row at the last chunk."""
    hw = pl.program_id(1)

    @pl.when(hw == 0)
    def _():
        ss_ref[...] = jnp.zeros_like(ss_ref)
        tt_ref[...] = jnp.zeros_like(tt_ref)
        st_ref[...] = jnp.zeros_like(st_ref)

    fs = fs_ref[...].astype(jnp.float32)          # (TBb, C, THW)
    ft = ft_ref[...].astype(jnp.float32)
    a_s = jnp.sum(fs * fs, axis=1) * inv_c        # (TBb, THW) = mean_C(f^2) chunk
    a_t = jnp.sum(ft * ft, axis=1) * inv_c

    ss_ref[...] += a_s * a_s
    tt_ref[...] += a_t * a_t
    st_ref[...] += a_s * a_t

    @pl.when(hw == pl.num_programs(1) - 1)
    def _():
        s_ss = jnp.sum(ss_ref[...], axis=1, keepdims=True)   # (TBb, 1)
        s_tt = jnp.sum(tt_ref[...], axis=1, keepdims=True)
        s_st = jnp.sum(st_ref[...], axis=1, keepdims=True)
        ns = jnp.maximum(jnp.sqrt(s_ss), _EPS)
        nt = jnp.maximum(jnp.sqrt(s_tt), _EPS)
        # per-row sum_hw (a_s/ns - a_t/nt)^2
        rows = s_ss / (ns * ns) + s_tt / (nt * nt) - 2.0 * s_st / (ns * nt)
        o_ref[...] = jnp.broadcast_to(rows[:, :, None], o_ref.shape)


def at_loss(f_s, f_t):
    # f_s, f_t: [B, C, H, W] (NCHW).  Flatten spatial to lanes.
    B, C, H, W = f_s.shape
    HW = H * W
    itemsize = max(f_s.dtype.itemsize, f_t.dtype.itemsize)
    budget = _input_budget_bytes()

    # Bytes per lane column per batch row: 2 inputs x 2 buffers + 3 f32 accumulators.
    per_row_lane = 4 * C * itemsize + 3 * 4
    TBb = _pick_at_batch_tile(B, per_row_lane, min(HW, 128), budget)
    per_lane = per_row_lane * TBb

    fs3 = f_s.reshape(B, C, HW)
    ft3 = f_t.reshape(B, C, HW)
    if per_lane * HW <= budget:
        # Whole spatial extent fits in one chunk (full-dim block: no 128 padding).
        HW_pad, THW = HW, HW
    else:
        # Stream 128-aligned spatial chunks; zero-pad HW (padded lanes contribute
        # 0 to the partial sums; the mean below divides by the true B*HW).
        HW_pad = _round_up(HW, 128)
        cap_lanes = max(128, (budget // per_lane) // 128 * 128)
        THW = _pick_divisor_tile(HW_pad, 128, cap_lanes)
        if HW_pad != HW:
            fs3 = jnp.pad(fs3, ((0, 0), (0, 0), (0, HW_pad - HW)))
            ft3 = jnp.pad(ft3, ((0, 0), (0, 0), (0, HW_pad - HW)))
    n_b, n_hw = B // TBb, HW_pad // THW

    # TODO(synk): on v7x with n_b == 1 an extra parallel HW split (partial
    # ss/tt/st outputs combined in JAX) would occupy both TensorCores.
    kern = functools.partial(_at_kernel, inv_c=1.0 / float(C))
    cost = pl.CostEstimate(
        flops=int(8 * B * C * HW_pad),
        transcendentals=int(2 * B),
        bytes_accessed=int(fs3.size * fs3.dtype.itemsize
                           + ft3.size * ft3.dtype.itemsize + B * 128 * 4),
    )
    needed = (4 * TBb * C * THW * itemsize         # 2 inputs x 2 pipeline buffers
              + 3 * TBb * THW * 4                  # ss/tt/st accumulators
              + 2 * TBb * 128 * 4)                 # output block double buffer
    rows = pl.pallas_call(
        kern,
        out_shape=jax.ShapeDtypeStruct((B, 1, 128), jnp.float32),
        grid=(n_b, n_hw),
        in_specs=[
            pl.BlockSpec((TBb, C, THW), lambda b, k: (b, 0, k)),
            pl.BlockSpec((TBb, C, THW), lambda b, k: (b, 0, k)),
        ],
        out_specs=pl.BlockSpec((TBb, 1, 128), lambda b, k: (b, 0, 0)),
        scratch_shapes=[pltpu.VMEM((TBb, THW), jnp.float32)] * 3,
        compiler_params=pltpu.CompilerParams(
            dimension_semantics=("parallel", "arbitrary"),
            vmem_limit_bytes=_vmem_limit_bytes(needed)),
        cost_estimate=cost,
    )(fs3, ft3)

    # mean over all B*HW elements of (at(f_s) - at(f_t))^2
    return jnp.sum(rows[:, 0, 0]) / float(B * HW)


# ------------------------------ module wrapper --------------------------------
class AttentionPallas:
    """Pallas port of the PyTorch `Attention` distillation-loss module."""

    def __init__(self, temperature=4.0, alpha=0.9, beta=1000.0, feature_dtype=None):
        self.T = temperature
        self.alpha = alpha
        self.beta = beta
        self.p = 2                      # fixed in the reference module
        # Optional: cast feature maps (e.g. jnp.bfloat16) to halve at_loss HBM
        # traffic; off by default to match the f32 reference bit-for-bit-ish.
        self.feature_dtype = feature_dtype

    def __call__(self, o_s, o_t, g_s, g_t):
        loss = self.alpha * kd_loss(o_s, o_t, self.T)
        at_total = jnp.float32(0.0)
        # TODO(synk): feature pairs have heterogeneous (C, H, W); fusing them
        # into a single pallas_call would need ragged/padded packing, so each
        # pair keeps its own fully-tiled streaming call (tiny pairs would be
        # cheaper as a fused XLA op but stay on the Pallas path here).
        for f_s, f_t in zip(g_s, g_t):
            if self.feature_dtype is not None:
                f_s = f_s.astype(self.feature_dtype)
                f_t = f_t.astype(self.feature_dtype)
            at_total = at_total + at_loss(f_s, f_t)
        return loss + self.beta * at_total


# --------------------------------- reference ----------------------------------
def _reference(o_s, o_t, g_s, g_t, T, alpha, beta):
    ls = jax.nn.log_softmax(o_s / T, axis=1)
    pt = jax.nn.softmax(o_t / T, axis=1)
    lpt = jax.nn.log_softmax(o_t / T, axis=1)
    kd = jnp.sum(pt * (lpt - ls)) * T * T / o_s.shape[0]

    def at(f):
        a = jnp.mean(f * f, axis=1).reshape(f.shape[0], -1)
        n = jnp.sqrt(jnp.sum(a * a, axis=1, keepdims=True))
        return a / jnp.maximum(n, 1e-12)

    at_sum = sum(jnp.mean((at(fs) - at(ft)) ** 2) for fs, ft in zip(g_s, g_t))
    return alpha * kd + beta * at_sum


if __name__ == "__main__":
    key = jax.random.PRNGKey(0)
    k1, k2, k3, k4, k5, k6 = jax.random.split(key, 6)

    B, K = 2, 10
    o_s = jax.random.normal(k1, (B, K), dtype=jnp.float32)
    o_t = jax.random.normal(k2, (B, K), dtype=jnp.float32)

    # two intermediate feature-map pairs (NCHW)
    g_s = [
        jax.random.normal(k3, (B, 4, 16, 16), dtype=jnp.float32),
        jax.random.normal(k4, (B, 8, 8, 8), dtype=jnp.float32),
    ]
    g_t = [
        jax.random.normal(k5, (B, 4, 16, 16), dtype=jnp.float32),
        jax.random.normal(k6, (B, 8, 8, 8), dtype=jnp.float32),
    ]

    mod = AttentionPallas(temperature=4.0, alpha=0.9, beta=1000.0)
    loss = mod(o_s, o_t, g_s, g_t)
    jax.block_until_ready(loss)

    ref = _reference(o_s, o_t, g_s, g_t, 4.0, 0.9, 1000.0)
    assert jnp.allclose(loss, ref, rtol=1e-4, atol=1e-5), (loss, ref)

    print("KERNEL_OK")
</pallas_src>

<mosaic_0001>
module attributes {stable_mosaic.version = 11 : i64} {
  func.func @_kd_kernel(%arg0: i32, %arg1: i32, %arg2: memref<2x10xf32, #tpu.memory_space<vmem>>, %arg3: memref<2x10xf32, #tpu.memory_space<vmem>>, %arg4: memref<1x1x128xf32, #tpu.memory_space<vmem>>, %arg5: memref<2x1xf32, #tpu.memory_space<vmem>>, %arg6: memref<2x1xf32, #tpu.memory_space<vmem>>, %arg7: memref<2x1xf32, #tpu.memory_space<vmem>>, %arg8: memref<2x1xf32, #tpu.memory_space<vmem>>, %arg9: memref<2x1xf32, #tpu.memory_space<vmem>>) attributes {dimension_semantics = [#tpu.dimension_semantics<parallel>, #tpu.dimension_semantics<arbitrary>], iteration_bounds = array<i64: 1, 1>, scalar_prefetch = 0 : i64, scratch_operands = 5 : i64, tpu.core_type = #tpu.core_type<tc>, window_params = [{transform_indices = @transform_0, window_bounds = array<i64: 2, 10>}, {transform_indices = @transform_1, window_bounds = array<i64: 2, 10>}, {transform_indices = @transform_2, window_bounds = array<i64: 1, 1, 128>}]} {
    %c0_i32 = arith.constant 0 : i32
    %0 = arith.cmpi eq, %arg1, %c0_i32 : i32
    %1 = arith.extui %0 : i1 to i32
    %c0_i32_0 = arith.constant 0 : i32
    %2 = arith.cmpi ne, %1, %c0_i32_0 : i32
    scf.if %2 {
      %cst_36 = arith.constant -1.000000e+30 : f32
      %54 = vector.broadcast %cst_36 : f32 to vector<2x1xf32>
      %c0_37 = arith.constant 0 : index
      %c0_38 = arith.constant 0 : index
      %55 = vector.load %arg5[%c0_37, %c0_38] : memref<2x1xf32, #tpu.memory_space<vmem>>, vector<2x1xf32>
      tpu.vector_store %arg5[%c0_37, %c0_38], %54 {strides = array<i32>} : memref<2x1xf32, #tpu.memory_space<vmem>>, vector<2x1xf32>,
      %cst_39 = arith.constant -1.000000e+30 : f32
      %56 = vector.broadcast %cst_39 : f32 to vector<2x1xf32>
      %c0_40 = arith.constant 0 : index
      %c0_41 = arith.constant 0 : index
      %57 = vector.load %arg7[%c0_40, %c0_41] : memref<2x1xf32, #tpu.memory_space<vmem>>, vector<2x1xf32>
      tpu.vector_store %arg7[%c0_40, %c0_41], %56 {strides = array<i32>} : memref<2x1xf32, #tpu.memory_space<vmem>>, vector<2x1xf32>,
      %cst_42 = arith.constant 0.000000e+00 : f32
      %58 = vector.broadcast %cst_42 : f32 to vector<2x1xf32>
      %c0_43 = arith.constant 0 : index
      %c0_44 = arith.constant 0 : index
      %59 = vector.load %arg6[%c0_43, %c0_44] : memref<2x1xf32, #tpu.memory_space<vmem>>, vector<2x1xf32>
      tpu.vector_store %arg6[%c0_43, %c0_44], %58 {strides = array<i32>} : memref<2x1xf32, #tpu.memory_space<vmem>>, vector<2x1xf32>,
      %cst_45 = arith.constant 0.000000e+00 : f32
      %60 = vector.broadcast %cst_45 : f32 to vector<2x1xf32>
      %c0_46 = arith.constant 0 : index
      %c0_47 = arith.constant 0 : index
      %61 = vector.load %arg8[%c0_46, %c0_47] : memref<2x1xf32, #tpu.memory_space<vmem>>, vector<2x1xf32>
      tpu.vector_store %arg8[%c0_46, %c0_47], %60 {strides = array<i32>} : memref<2x1xf32, #tpu.memory_space<vmem>>, vector<2x1xf32>,
      %cst_48 = arith.constant 0.000000e+00 : f32
      %62 = vector.broadcast %cst_48 : f32 to vector<2x1xf32>
      %c0_49 = arith.constant 0 : index
      %c0_50 = arith.constant 0 : index
      %63 = vector.load %arg9[%c0_49, %c0_50] : memref<2x1xf32, #tpu.memory_space<vmem>>, vector<2x1xf32>
      tpu.vector_store %arg9[%c0_49, %c0_50], %62 {strides = array<i32>} : memref<2x1xf32, #tpu.memory_space<vmem>>, vector<2x1xf32>,
    } else {
    }
    %c0 = arith.constant 0 : index
    %c0_1 = arith.constant 0 : index
    %3 = vector.load %arg2[%c0, %c0_1] : memref<2x10xf32, #tpu.memory_space<vmem>>, vector<2x10xf32>
    %cst = arith.constant 2.500000e-01 : f32
    %4 = vector.broadcast %cst : f32 to vector<2x10xf32>
    %5 = arith.mulf %3, %4 : vector<2x10xf32>
    %c0_2 = arith.constant 0 : index
    %c0_3 = arith.constant 0 : index
    %6 = vector.load %arg3[%c0_2, %c0_3] : memref<2x10xf32, #tpu.memory_space<vmem>>, vector<2x10xf32>
    %cst_4 = arith.constant 2.500000e-01 : f32
    %7 = vector.broadcast %cst_4 : f32 to vector<2x10xf32>
    %8 = arith.mulf %6, %7 : vector<2x10xf32>
    %c0_5 = arith.constant 0 : index
    %c0_6 = arith.constant 0 : index
    %9 = vector.load %arg5[%c0_5, %c0_6] : memref<2x1xf32, #tpu.memory_space<vmem>>, vector<2x1xf32>
    %cst_7 = arith.constant dense<0xFF800000> : vector<2xf32>
    %10 = vector.multi_reduction <maximumf>, %5, %cst_7 [1] : vector<2x10xf32> to vector<2xf32>
    %11 = vector.shape_cast %10 : vector<2xf32> to vector<2x1xf32>
    %12 = arith.maximumf %9, %11 : vector<2x1xf32>
    %c0_8 = arith.constant 0 : index
    %c0_9 = arith.constant 0 : index
    %13 = vector.load %arg6[%c0_8, %c0_9] : memref<2x1xf32, #tpu.memory_space<vmem>>, vector<2x1xf32>
    %c0_10 = arith.constant 0 : index
    %c0_11 = arith.constant 0 : index
    %14 = vector.load %arg5[%c0_10, %c0_11] : memref<2x1xf32, #tpu.memory_space<vmem>>, vector<2x1xf32>
    %15 = arith.subf %14, %12 : vector<2x1xf32>
    %16 = math.exp %15 : vector<2x1xf32>
    %17 = arith.mulf %13, %16 : vector<2x1xf32>
    %18 = vector.broadcast %12 : vector<2x1xf32> to vector<2x10xf32>
    %19 = arith.subf %5, %18 : vector<2x10xf32>
    %20 = math.exp %19 : vector<2x10xf32>
    %cst_12 = arith.constant dense<0.000000e+00> : vector<2xf32>
    %21 = vector.multi_reduction <add>, %20, %cst_12 [1] : vector<2x10xf32> to vector<2xf32>
    %22 = vector.shape_cast %21 : vector<2xf32> to vector<2x1xf32>
    %23 = arith.addf %17, %22 : vector<2x1xf32>
    %c0_13 = arith.constant 0 : index
    %c0_14 = arith.constant 0 : index
    %24 = vector.load %arg6[%c0_13, %c0_14] : memref<2x1xf32, #tpu.memory_space<vmem>>, vector<2x1xf32>
    tpu.vector_store %arg6[%c0_13, %c0_14], %23 {strides = array<i32>} : memref<2x1xf32, #tpu.memory_space<vmem>>, vector<2x1xf32>,
    %c0_15 = arith.constant 0 : index
    %c0_16 = arith.constant 0 : index
    %25 = vector.load %arg5[%c0_15, %c0_16] : memref<2x1xf32, #tpu.memory_space<vmem>>, vector<2x1xf32>
    tpu.vector_store %arg5[%c0_15, %c0_16], %12 {strides = array<i32>} : memref<2x1xf32, #tpu.memory_space<vmem>>, vector<2x1xf32>,
    %c0_17 = arith.constant 0 : index
    %c0_18 = arith.constant 0 : index
    %26 = vector.load %arg7[%c0_17, %c0_18] : memref<2x1xf32, #tpu.memory_space<vmem>>, vector<2x1xf32>
    %cst_19 = arith.constant dense<0xFF800000> : vector<2xf32>
    %27 = vector.multi_reduction <maximumf>, %8, %cst_19 [1] : vector<2x10xf32> to vector<2xf32>
    %28 = vector.shape_cast %27 : vector<2xf32> to vector<2x1xf32>
    %29 = arith.maximumf %26, %28 : vector<2x1xf32>
    %c0_20 = arith.constant 0 : index
    %c0_21 = arith.constant 0 : index
    %30 = vector.load %arg7[%c0_20, %c0_21] : memref<2x1xf32, #tpu.memory_space<vmem>>, vector<2x1xf32>
    %31 = arith.subf %30, %29 : vector<2x1xf32>
    %32 = math.exp %31 : vector<2x1xf32>
    %33 = vector.broadcast %29 : vector<2x1xf32> to vector<2x10xf32>
    %34 = arith.subf %8, %33 : vector<2x10xf32>
    %35 = math.exp %34 : vector<2x10xf32>
    %c0_22 = arith.constant 0 : index
    %c0_23 = arith.constant 0 : index
    %36 = vector.load %arg8[%c0_22, %c0_23] : memref<2x1xf32, #tpu.memory_space<vmem>>, vector<2x1xf32>
    %37 = arith.mulf %36, %32 : vector<2x1xf32>
    %cst_24 = arith.constant dense<0.000000e+00> : vector<2xf32>
    %38 = vector.multi_reduction <add>, %35, %cst_24 [1] : vector<2x10xf32> to vector<2xf32>
    %39 = vector.shape_cast %38 : vector<2xf32> to vector<2x1xf32>
    %40 = arith.addf %37, %39 : vector<2x1xf32>
    %c0_25 = arith.constant 0 : index
    %c0_26 = arith.constant 0 : index
    %41 = vector.load %arg8[%c0_25, %c0_26] : memref<2x1xf32, #tpu.memory_space<vmem>>, vector<2x1xf32>
    tpu.vector_store %arg8[%c0_25, %c0_26], %40 {strides = array<i32>} : memref<2x1xf32, #tpu.memory_space<vmem>>, vector<2x1xf32>,
    %c0_27 = arith.constant 0 : index
    %c0_28 = arith.constant 0 : index
    %42 = vector.load %arg9[%c0_27, %c0_28] : memref<2x1xf32, #tpu.memory_space<vmem>>, vector<2x1xf32>
    %43 = arith.mulf %42, %32 : vector<2x1xf32>
    %44 = arith.subf %8, %5 : vector<2x10xf32>
    %45 = arith.mulf %35, %44 : vector<2x10xf32>
    %cst_29 = arith.constant dense<0.000000e+00> : vector<2xf32>
    %46 = vector.multi_reduction <add>, %45, %cst_29 [1] : vector<2x10xf32> to vector<2xf32>
    %47 = vector.shape_cast %46 : vector<2xf32> to vector<2x1xf32>
    %48 = arith.addf %43, %47 : vector<2x1xf32>
    %c0_30 = arith.constant 0 : index
    %c0_31 = arith.constant 0 : index
    %49 = vector.load %arg9[%c0_30, %c0_31] : memref<2x1xf32, #tpu.memory_space<vmem>>, vector<2x1xf32>
    tpu.vector_store %arg9[%c0_30, %c0_31], %48 {strides = array<i32>} : memref<2x1xf32, #tpu.memory_space<vmem>>, vector<2x1xf32>,
    %c0_32 = arith.constant 0 : index
    %c0_33 = arith.constant 0 : index
    %50 = vector.load %arg7[%c0_32, %c0_33] : memref<2x1xf32, #tpu.memory_space<vmem>>, vector<2x1xf32>
    tpu.vector_store %arg7[%c0_32, %c0_33], %29 {strides = array<i32>} : memref<2x1xf32, #tpu.memory_space<vmem>>, vector<2x1xf32>,
    %c0_i32_34 = arith.constant 0 : i32
    %51 = arith.cmpi eq, %arg1, %c0_i32_34 : i32
    %52 = arith.extui %51 : i1 to i32
    %c0_i32_35 = arith.constant 0 : i32
    %53 = arith.cmpi ne, %52, %c0_i32_35 : i32
    scf.if %53 {
      %c0_36 = arith.constant 0 : index
      %c0_37 = arith.constant 0 : index
      %54 = vector.load %arg9[%c0_36, %c0_37] : memref<2x1xf32, #tpu.memory_space<vmem>>, vector<2x1xf32>
      %c0_38 = arith.constant 0 : index
      %c0_39 = arith.constant 0 : index
      %55 = vector.load %arg8[%c0_38, %c0_39] : memref<2x1xf32, #tpu.memory_space<vmem>>, vector<2x1xf32>
      %56 = arith.divf %54, %55 : vector<2x1xf32>
      %c0_40 = arith.constant 0 : index
      %c0_41 = arith.constant 0 : index
      %57 = vector.load %arg5[%c0_40, %c0_41] : memref<2x1xf32, #tpu.memory_space<vmem>>, vector<2x1xf32>
      %58 = arith.addf %56, %57 : vector<2x1xf32>
      %c0_42 = arith.constant 0 : index
      %c0_43 = arith.constant 0 : index
      %59 = vector.load %arg7[%c0_42, %c0_43] : memref<2x1xf32, #tpu.memory_space<vmem>>, vector<2x1xf32>
      %60 = arith.subf %58, %59 : vector<2x1xf32>
      %c0_44 = arith.constant 0 : index
      %c0_45 = arith.constant 0 : index
      %61 = vector.load %arg6[%c0_44, %c0_45] : memref<2x1xf32, #tpu.memory_space<vmem>>, vector<2x1xf32>
      %62 = math.log %61 : vector<2x1xf32>
      %63 = arith.addf %60, %62 : vector<2x1xf32>
      %c0_46 = arith.constant 0 : index
      %c0_47 = arith.constant 0 : index
      %64 = vector.load %arg8[%c0_46, %c0_47] : memref<2x1xf32, #tpu.memory_space<vmem>>, vector<2x1xf32>
      %65 = math.log %64 : vector<2x1xf32>
      %66 = arith.subf %63, %65 : vector<2x1xf32>
      %67 = vector.shape_cast %66 : vector<2x1xf32> to vector<1x2x1xf32>
      %cst_48 = arith.constant dense<0.000000e+00> : vector<1xf32>
      %68 = vector.multi_reduction <add>, %67, %cst_48 [1, 2] : vector<1x2x1xf32> to vector<1xf32>
      %69 = vector.shape_cast %68 : vector<1xf32> to vector<1x1x1xf32>
      %70 = vector.extract %69[0, 0, 0] : f32 from vector<1x1x1xf32>
      %71 = vector.broadcast %70 : f32 to vector<1x1x128xf32>
      %c0_49 = arith.constant 0 : index
      %c0_50 = arith.constant 0 : index
      %c0_51 = arith.constant 0 : index
      %72 = vector.load %arg4[%c0_49, %c0_50, %c0_51] : memref<1x1x128xf32, #tpu.memory_space<vmem>>, vector<1x1x128xf32>
      tpu.vector_store %arg4[%c0_49, %c0_50, %c0_51], %71 {strides = array<i32>} : memref<1x1x128xf32, #tpu.memory_space<vmem>>, vector<1x1x128xf32>,
    } else {
    }
    return
  }
  func.func @transform_0(%arg0: i32, %arg1: i32) -> (i32, i32) {
    %c0_i32 = arith.constant 0 : i32
    return %arg0, %arg1 : i32, i32
  }
  func.func @transform_1(%arg0: i32, %arg1: i32) -> (i32, i32) {
    %c0_i32 = arith.constant 0 : i32
    return %arg0, %arg1 : i32, i32
  }
  func.func @transform_2(%arg0: i32, %arg1: i32) -> (i32, i32, i32) {
    %c0_i32 = arith.constant 0 : i32
    %c0_i32_0 = arith.constant 0 : i32
    %c0_i32_1 = arith.constant 0 : i32
    return %arg0, %c0_i32, %c0_i32_0 : i32, i32, i32
  }
}

</mosaic_0001>

<bundles_post_ra>
// kernel: tpu_custom_call.1
= control target key start
LH: loop header
LB: loop body
LE: loop exit
PB: predicated region body
PF: predicated region fallthrough
CT: control target
= control target key end

     0   :  { %7 = vsyncpa [#allocation8], 0  ;;  %s276_s0 = inlined_call_operand.hbm [shape: f32[2,10], index: 0, kind: input, shape index: {}]   ;;  %s277_s1 = inlined_call_operand.vmem [shape: f32[2,10], index: 1, kind: input, shape index: {}]   ;;  %s278_s2 = inlined_call_operand.hbm [shape: f32[1,1,128], index: 2, kind: output, shape index: {}]  }
   0x1   :  { %8 = vsyncpa [#allocation9], 0  ;;  %s213_s9 = smov [#allocation7]   ;;  %s165_s13 = scalar_lea.hbm %s276_s0, 32 }
   0x2   :  { %s15_s10 = sshll.u32 %s213_s9, 4  ;;  %p166_p0 = scmp.ne.s32.totalorder %s276_s0, %s165_s13  ;;  %s16_s10 = int_to_ptr.vmem [resolvable:$true] %s15_s10 }
   0x3   :  { %p169_p1 = scmp.lt.u32.totalorder %s165_s13, %s276_s0 }
   0x5   :  { %p171_p2 = pnand %p169_p1, %p166_p0 }
   0x7   :  { %174 = shalt.err (!%p171_p2)
}
   0x8   :  { %s175_s18 = scalar_lea.vmem %s16_s10, 32  ;;  %p180_p4 = scmp.lt.s32.totalorder %s16_s10, %s16_s10 }
   0x9   :  { %p176_p3 = scmp.ne.s32.totalorder %s16_s10, %s175_s18  ;;  %p181_p5 = scmp.lt.s32.totalorder %s175_s18, %s175_s18 }
   0xb   :  { %p182_p6 = por %p181_p5, %p180_p4 }
   0xd   :  { %p183_p7 = pnand %p182_p6, %p176_p3 }
   0xf   :  { %186 = shalt.err (!%p183_p7)
}
  0x10   :  { %18 = dma.hbm_to_vmem [thread:$0]  %s276_s0, 32, %s16_s10, [#allocation8]  }
  0x11   :  { %209 = dma.done.wait [#allocation8], 32  }
  0x12   :  { %210 = vsyncadd [#allocation8], 4294967264  ;;  %vm28_vm0 = vcmask 1024   ;;  %v214_v0 = vmov -1e+30   ;;  %vm39_vm1 = vcmask 74752  }
  0x13   :  { %30 = vst.msk [vmem:[#allocation4] sm:$0x3] %vm28_vm0, %v214_v0  ;;  %29 = vst.msk [vmem:[#allocation2] sm:$0x3] %vm28_vm0, %v214_v0  ;;  %v36_v1 = vld [vmem:[%s277_s1] sm:$0x3] }
  0x14   :  { %v34_v2 = vld [vmem:[#allocation7] sm:$0x3]  ;;  %v37_v3 = vmul.f32 0.25, %v36_v1  ;;  %v215_v7 = vmov 0   ;;  %v216_v8 = vmov 0.0   ;;  %s217_s0 = smov [#allocation10]  }
  0x15   :  { %v35_v4 = vmul.f32 0.25, %v34_v2  ;;  %149 = vset.pattern.permute.xlu1 %v215_v7  ;;  %150 = vset.pattern.permute.xlu0 %v215_v7  ;;  %32 = vst.msk [vmem:[#allocation5] sm:$0x3] %vm28_vm0, %v216_v8  ;;  %31 = vst.msk [vmem:[#allocation3] sm:$0x3] %vm28_vm0, %v216_v8  ;;  %s133_s1 = sshll.u32 %s217_s0, 4  ;;  %s134_s1 = int_to_ptr.vmem [resolvable:$true] %s133_s1 }
  0x16   :  { %v65_v5 = vsel %vm39_vm1, %v37_v3, -inf  ;;  %33 = vst.msk [vmem:[#allocation6] sm:$0x3] %vm28_vm0, %v216_v8  ;;  %s187_s24 = scalar_lea.vmem %s134_s1, 16  ;;  %s191_s25 = scalar_lea.vmem %s134_s1, 32 }
  0x17   :  { %66 = vmax.xlane.f32.xlu0 %v65_v5  ;;  %v40_v6 = vsel %vm39_vm1, %v35_v4, -inf  ;;  %v89_v23 = vsub.f32 %v37_v3, %v35_v4  ;;  %p188_p8 = scmp.ne.s32.totalorder %s134_s1, %s187_s24  ;;  %p192_p9 = scmp.lt.s32.totalorder %s134_s1, %s134_s1 }
  0x18   :  { %p193_p10 = scmp.lt.s32.totalorder %s191_s25, %s187_s24 }
  0x1a   :  { %v64_v9 = vld [vmem:[#allocation4] sm:$0x3]  ;;  %v38_v12 = vld [vmem:[#allocation2] sm:$0x3]  ;;  %p194_p11 = por %p193_p10, %p192_p9 }
  0x1b   :  { %41 = vmax.xlane.f32.xlu0 %v40_v6 }
  0x1c   :  { %v80_v33 = vld [vmem:[#allocation5] sm:$0x3]  ;;  %v44_v38 = vld [vmem:[#allocation3] sm:$0x3]  ;;  %p195_p12 = pnand %p194_p11, %p188_p8 }
  0x1d   :  { %v87_v37 = vld [vmem:[#allocation6] sm:$0x3] }
  0xa4   :  { %v67_v10 = vpop.xlane.xlu0 %66 }
  0xa5   :  { %v68_v11 = vmax.f32 %v64_v9, %v67_v10 }
  0xa7   :  { %v69_v13 = vsub.f32 %v64_v9, %v68_v11  ;;  %96 = vst.msk [vmem:[#allocation4] sm:$0x3] %vm28_vm0, %v68_v11  ;;  %74 = vperm.xlu1 %149, %v68_v11  }
  0xa8   :  { %v42_v14 = vpop.xlane.xlu0 %41 }
  0xa9   :  { %v43_v15 = vmax.f32 %v38_v12, %v42_v14  ;;  %v70_v30 = vmul.f32 1.442695, %v69_v13 }
  0xab   :  { %v45_v16 = vsub.f32 %v38_v12, %v43_v15  ;;  %63 = vst.msk [vmem:[#allocation2] sm:$0x3] %vm28_vm0, %v43_v15  ;;  %51 = vperm.xlu1 %149, %v43_v15  }
  0xad   :  { %v46_v31 = vmul.f32 1.442695, %v45_v16 }
  0xae   :  { %v106_v55 = vld [vmem:[#allocation4] sm:$0x3] }
  0xb2   :  { %v104_v51 = vld [vmem:[#allocation2] sm:$0x3] }
 0x126   :  { %v75_v17 = vpop.permute.xlu1 %74 }
 0x127   :  { %v77_v18 = vsub.f32 %v37_v3, %v75_v17 }
 0x129   :  { %v78_v19 = vmul.f32 1.442695, %v77_v18 }
 0x12a   :  { %v52_v20 = vpop.permute.xlu1 %51 }
 0x12b   :  { %151 = vpow2.f32 %v78_v19  ;;  %v54_v21 = vsub.f32 %v35_v4, %v52_v20 }
 0x12d   :  { %v55_v22 = vmul.f32 1.442695, %v54_v21 }
 0x12f   :  { %153 = vpow2.f32 %v55_v22 }
 0x130   :  { %155 = vpow2.f32 %v70_v30 }
 0x131   :  { %157 = vpow2.f32 %v46_v31 }
 0x135   :  { %v152_v24 = vpop.eup %151 }
 0x136   :  { %v82_v25 = vsel %vm39_vm1, %v152_v24, 0.0  ;;  %v90_v26 = vmul.f32 %v152_v24, %v89_v23 }
 0x137   :  { %83 = vadd.xlane.f32.xlu0 %v82_v25 }
 0x138   :  { %v91_v28 = vsel %vm39_vm1, %v90_v26, 0.0 }
 0x139   :  { %v154_v27 = vpop.eup %153 }
 0x13a   :  { %v57_v29 = vsel %vm39_vm1, %v154_v27, 0.0  ;;  %v156_v32 = vpop.eup %155 }
 0x13b   :  { %92 = vadd.xlane.f32.xlu0 %v91_v28  ;;  %58 = vadd.xlane.f32.xlu1 %v57_v29  ;;  %v81_v34 = vmul.f32 %v156_v32, %v80_v33  ;;  %v158_v35 = vpop.eup %157  ;;  %v88_v40 = vmul.f32 %v156_v32, %v87_v37 }
 0x13c   :  { %v48_v41 = vmul.f32 %v158_v35, %v44_v38 }
 0x1c4   :  { %v84_v36 = vpop.xlane.xlu0 %83 }
 0x1c5   :  { %v85_v39 = vadd.f32 %v84_v36, %v81_v34 }
 0x1c7   :  { %86 = vst.msk [vmem:[#allocation5] sm:$0x3] %vm28_vm0, %v85_v39 }
 0x1c8   :  { %v93_v42 = vpop.xlane.xlu0 %92  ;;  %v59_v43 = vpop.xlane.xlu1 %58 }
 0x1c9   :  { %v94_v44 = vadd.f32 %v93_v42, %v88_v40  ;;  %v60_v45 = vadd.f32 %v59_v43, %v48_v41 }
 0x1cb   :  { %95 = vst.msk [vmem:[#allocation6] sm:$0x3] %vm28_vm0, %v94_v44  ;;  %62 = vst.msk [vmem:[#allocation3] sm:$0x3] %vm28_vm0, %v60_v45 }
 0x1ce   :  { %v101_v46 = vld [vmem:[#allocation5] sm:$0x3] }
 0x1cf   :  { %159 = vrcp.f32 %v101_v46 }
 0x1d0   :  { %161 = vlog2.f32 %v101_v46 }
 0x1d2   :  { %v108_v47 = vld [vmem:[#allocation3] sm:$0x3]  ;;  %v100_v49 = vld [vmem:[#allocation6] sm:$0x3] }
 0x1d3   :  { %163 = vlog2.f32 %v108_v47 }
 0x1d9   :  { %v160_v48 = vpop.eup %159 }
 0x1da   :  { %v103_v50 = vmul.f32 %v160_v48, %v100_v49  ;;  %v162_v52 = vpop.eup %161 }
 0x1db   :  { %v113_v59 = vmul.f32 0.6931472, %v162_v52 }
 0x1dc   :  { %v105_v53 = vadd.f32 %v104_v51, %v103_v50 }
 0x1dd   :  { %v164_v54 = vpop.eup %163 }
 0x1de   :  { %v107_v56 = vsub.f32 %v105_v53, %v106_v55  ;;  %v110_v57 = vmul.f32 0.6931472, %v164_v54 }
 0x1e0   :  { %v111_v58 = vadd.f32 %v110_v57, %v107_v56 }
 0x1e2   :  { %v114_v60 = vsub.f32 %v111_v58, %v113_v59 }
 0x1e4   :  { %v115_v61 = vsel %vm28_vm0, %v114_v60, 0.0 }
 0x1e5   :  { %116 = vadd.xlane.f32.xlu0 %v115_v61 }
 0x272   :  { %v117_v62 = vpop.xlane.xlu0 %116 }
 0x273   :  { %v118_v63 = vrot.slane %v117_v62, 4 }
 0x275   :  { %v119_v0 = vadd.f32 %v118_v63, %v117_v62 }
 0x277   :  { %v120_v1 = vrot.slane %v119_v0, 2 }
 0x279   :  { %v121_v2 = vadd.f32 %v120_v1, %v119_v0 }
 0x27b   :  { %v122_v3 = vrot.slane %v121_v2, 1 }
 0x27d   :  { %v123_v4 = vadd.f32 %v122_v3, %v121_v2 }
 0x27f   :  { %142 = vpush %v123_v4 }
 0x2b0   :  { %s143_s23 = spop %142 }
 0x2b1   :  { %v125_v5 = vstv %s143_s23 }
 0x2b2   :  { %126 = vst [vmem:[#allocation10] sm:$0x1] %v125_v5 }
 0x2b3   :  { %198 = shalt.err (!%p195_p12)
}
 0x2b4   :  { %s199_s28 = scalar_lea.hbm %s278_s2, 16 }
 0x2b5   :  { %p200_p13 = scmp.ne.s32.totalorder %s278_s2, %s199_s28  ;;  %p203_p0 = scmp.lt.u32.totalorder %s199_s28, %s278_s2 }
 0x2b7   :  { %p205_p1 = pnand %p203_p0, %p200_p13 }
 0x2b9   :  { %208 = shalt.err (!%p205_p1)
}
 0x2ba   :  { %136 = dma.vmem_to_hbm [thread:$0]  %s134_s1, 16, %s278_s2, [#allocation9]  }
 0x2bb   :  { %211 = dma.done.wait [#allocation9], 16  }
 0x2bc   :  { %212 = vsyncadd [#allocation9], 4294967280 }
 0x2bd   :  { %140 = vsyncpa [#allocation8], 1 }
 0x2be   :  { %141 = vsyncpa [#allocation9], 1 }

</bundles_post_ra>
